<compile_context>
chip_gen: v5e
topology: v5e:2x2
jax: 0.10.0
libtpu: 0.0.40
codegen_flags: <defaults>
</compile_context>

<pallas_src>
import functools

import jax
import jax.numpy as jnp
from jax.experimental import pallas as pl
from jax.experimental.pallas import tpu as pltpu

IN_DIM = 16
HIDDEN = 128
OUT_DIM = 60
OUT_PAD = 128  # lane-dense output width (multiple of 128); cols 60..127 are zeros


def _round_up(n, m):
    return ((n + m - 1) // m) * m


def mlp_kernel(x_ref, w1_ref, b1_ref, w2_ref, b2_ref, w3_ref, b3_ref,
               w4_ref, b4_ref, out_ref):
    # Fused forward for one row tile: 4 MXU matmuls (bf16 operands, f32
    # accumulation) + VPU bias-add / ReLU in f32.
    x = x_ref[...]  # already bf16 (cast once in the wrapper)

    h = jnp.dot(x, w1_ref[...], preferred_element_type=jnp.float32) + b1_ref[...]
    h = jnp.maximum(h, 0.0).astype(jnp.bfloat16)

    h = jnp.dot(h, w2_ref[...], preferred_element_type=jnp.float32) + b2_ref[...]
    h = jnp.maximum(h, 0.0).astype(jnp.bfloat16)

    h = jnp.dot(h, w3_ref[...], preferred_element_type=jnp.float32) + b3_ref[...]
    h = jnp.maximum(h, 0.0).astype(jnp.bfloat16)

    logits = jnp.dot(h, w4_ref[...], preferred_element_type=jnp.float32) + b4_ref[...]
    out_ref[...] = logits.astype(out_ref.dtype)


def prepare_params(params):
    """One-time prep: pad last layer 60->128 output cols, cast weights to bf16.

    Biases stay f32 (added to the f32 accumulator on the VPU).
    Returns a flat tuple (w1, b1, w2, b2, w3, b3, w4p, b4p).
    """
    (w1, b1), (w2, b2), (w3, b3), (w4, b4) = params
    w4p = jnp.zeros((w4.shape[0], OUT_PAD), w4.dtype).at[:, :OUT_DIM].set(w4)
    b4p = jnp.zeros((1, OUT_PAD), b4.dtype).at[:, :OUT_DIM].set(b4)
    return (w1.astype(jnp.bfloat16), b1,
            w2.astype(jnp.bfloat16), b2,
            w3.astype(jnp.bfloat16), b3,
            w4p.astype(jnp.bfloat16), b4p)


@functools.partial(jax.jit, static_argnames=("block_tm", "out_dtype", "trim"))
def mlp_forward(x, prepared, *, block_tm=1024, out_dtype=jnp.bfloat16, trim=True):
    """x: [batch, 16].  prepared: output of prepare_params().

    trim=True  -> returns [batch, 60]   (module semantics)
    trim=False -> returns [batch, 128]  (lane-dense; cols 60..127 are zeros,
                                         avoids the extra post-kernel HBM pass)
    """
    wb1, b1, wb2, b2, wb3, b3, wb4, b4p = prepared
    batch = x.shape[0]

    x = x.astype(jnp.bfloat16)  # single wrapper cast; kernel consumes bf16 directly

    # Row tile: as large as possible (step-overhead bound at these sizes) while
    # keeping >= 2 grid steps when batch permits, so "parallel" can shard the
    # batch axis across both v7x TensorCores.  Rounded to the sublane multiple 8.
    tm = max(8, min(block_tm, _round_up(pl.cdiv(batch, 2), 8)))
    n_blocks = pl.cdiv(batch, tm)  # ragged last block handled by Pallas masking

    def resident(a):  # full-array block, same block every step -> stays in VMEM
        return pl.BlockSpec(a.shape, lambda i: (0,) * a.ndim)

    out = pl.pallas_call(
        mlp_kernel,
        out_shape=jax.ShapeDtypeStruct((batch, OUT_PAD), out_dtype),
        grid_spec=pltpu.PrefetchScalarGridSpec(
            num_scalar_prefetch=0,
            grid=(n_blocks,),
            in_specs=[
                pl.BlockSpec((tm, IN_DIM), lambda i: (i, 0)),  # x: tiled over rows
                resident(wb1), resident(b1),
                resident(wb2), resident(b2),
                resident(wb3), resident(b3),
                resident(wb4), resident(b4p),
            ],
            out_specs=pl.BlockSpec((tm, OUT_PAD), lambda i: (i, 0)),
        ),
        compiler_params=pltpu.CompilerParams(
            dimension_semantics=("parallel",)),  # batch tiles shard across TCs on v7x
    )(x, wb1, b1, wb2, b2, wb3, b3, wb4, b4p)

    if trim:
        return out[:, :OUT_DIM]
    return out


def init_linear(key, in_features, out_features):
    # Deterministic init matching PyTorch nn.Linear default:
    # U(-1/sqrt(in_features), 1/sqrt(in_features)) for weight and bias.
    kw, kb = jax.random.split(key)
    bound = 1.0 / (in_features ** 0.5)
    w = jax.random.uniform(kw, (in_features, out_features), jnp.float32,
                           minval=-bound, maxval=bound)
    b = jax.random.uniform(kb, (1, out_features), jnp.float32,
                           minval=-bound, maxval=bound)
    return w, b


def reference_forward(x, params):
    h = x
    for i, (w, b) in enumerate(params):
        h = h @ w + b
        if i < len(params) - 1:
            h = jnp.maximum(h, 0.0)
    return h


if __name__ == "__main__":
    key = jax.random.PRNGKey(0)
    k_x, k1, k2, k3, k4 = jax.random.split(key, 5)

    params = [
        init_linear(k1, IN_DIM, HIDDEN),
        init_linear(k2, HIDDEN, HIDDEN),
        init_linear(k3, HIDDEN, HIDDEN),
        init_linear(k4, HIDDEN, OUT_DIM),
    ]
    prepped = prepare_params(params)  # pad + bf16 casts done once, not per call

    # Small batch (matches the original test shape).
    batch = 8
    x = jax.random.normal(k_x, (batch, IN_DIM), jnp.float32)
    out = jax.block_until_ready(mlp_forward(x, prepped))
    ref = reference_forward(x, params)
    assert out.shape == (batch, OUT_DIM), out.shape
    # bf16 MXU operands / bf16 output with f32 accumulation -> relaxed tolerance.
    assert jnp.allclose(out.astype(jnp.float32), ref, atol=5e-2, rtol=5e-2), \
        "mismatch vs JAX reference (batch=8)"

    # Larger, non-tile-multiple batch: exercises the 2-block grid (v7x path) and
    # the ragged last tile (masked store, no wrapper-side jnp.pad).
    batch2 = 300
    x2 = jax.random.normal(k_x, (batch2, IN_DIM), jnp.float32)
    out2 = jax.block_until_ready(mlp_forward(x2, prepped))
    ref2 = reference_forward(x2, params)
    assert out2.shape == (batch2, OUT_DIM), out2.shape
    assert jnp.allclose(out2.astype(jnp.float32), ref2, atol=5e-2, rtol=5e-2), \
        "mismatch vs JAX reference (batch=300)"

    # Lane-dense (untrimmed) output path: no post-kernel column slice.
    out2_pad = jax.block_until_ready(mlp_forward(x2, prepped, trim=False))
    assert out2_pad.shape == (batch2, OUT_PAD), out2_pad.shape
    assert jnp.allclose(out2_pad[:, :OUT_DIM].astype(jnp.float32), ref2,
                        atol=5e-2, rtol=5e-2), "mismatch (padded output path)"

    print("KERNEL_OK")
</pallas_src>

<mosaic_0001>
module attributes {stable_mosaic.version = 11 : i64} {
  func.func @mlp_kernel(%arg0: i32, %arg1: memref<8x16xbf16, #tpu.memory_space<vmem>>, %arg2: memref<16x128xbf16, #tpu.memory_space<vmem>>, %arg3: memref<1x128xf32, #tpu.memory_space<vmem>>, %arg4: memref<128x128xbf16, #tpu.memory_space<vmem>>, %arg5: memref<1x128xf32, #tpu.memory_space<vmem>>, %arg6: memref<128x128xbf16, #tpu.memory_space<vmem>>, %arg7: memref<1x128xf32, #tpu.memory_space<vmem>>, %arg8: memref<128x128xbf16, #tpu.memory_space<vmem>>, %arg9: memref<1x128xf32, #tpu.memory_space<vmem>>, %arg10: memref<8x128xbf16, #tpu.memory_space<vmem>>) attributes {dimension_semantics = [#tpu.dimension_semantics<parallel>], iteration_bounds = array<i64: 1>, scalar_prefetch = 0 : i64, scratch_operands = 0 : i64, tpu.core_type = #tpu.core_type<tc>, window_params = [{transform_indices = @transform_0, window_bounds = array<i64: 8, 16>}, {pipeline_mode = #tpu.pipeline_mode<synchronous>, transform_indices = @transform_1, window_bounds = array<i64: 16, 128>}, {pipeline_mode = #tpu.pipeline_mode<synchronous>, transform_indices = @transform_2, window_bounds = array<i64: 1, 128>}, {pipeline_mode = #tpu.pipeline_mode<synchronous>, transform_indices = @transform_3, window_bounds = array<i64: 128, 128>}, {pipeline_mode = #tpu.pipeline_mode<synchronous>, transform_indices = @transform_4, window_bounds = array<i64: 1, 128>}, {pipeline_mode = #tpu.pipeline_mode<synchronous>, transform_indices = @transform_5, window_bounds = array<i64: 128, 128>}, {pipeline_mode = #tpu.pipeline_mode<synchronous>, transform_indices = @transform_6, window_bounds = array<i64: 1, 128>}, {pipeline_mode = #tpu.pipeline_mode<synchronous>, transform_indices = @transform_7, window_bounds = array<i64: 128, 128>}, {pipeline_mode = #tpu.pipeline_mode<synchronous>, transform_indices = @transform_8, window_bounds = array<i64: 1, 128>}, {transform_indices = @transform_9, window_bounds = array<i64: 8, 128>}]} {
    %c0 = arith.constant 0 : index
    %c0_0 = arith.constant 0 : index
    %0 = vector.load %arg1[%c0, %c0_0] : memref<8x16xbf16, #tpu.memory_space<vmem>>, vector<8x16xbf16>
    %c0_1 = arith.constant 0 : index
    %c0_2 = arith.constant 0 : index
    %1 = vector.load %arg2[%c0_1, %c0_2] : memref<16x128xbf16, #tpu.memory_space<vmem>>, vector<16x128xbf16>
    %cst = arith.constant dense<0.000000e+00> : vector<8x128xf32>
    %2 = tpu.matmul %0, %1, %cst {dimension_numbers = #tpu.dot_dimension_numbers<[1], [0], [0], [1], [0, 0, 1, 1], [], []>} : vector<8x16xbf16>, vector<16x128xbf16>, vector<8x128xf32> -> vector<8x128xf32>
    %c0_3 = arith.constant 0 : index
    %c0_4 = arith.constant 0 : index
    %3 = vector.load %arg3[%c0_3, %c0_4] : memref<1x128xf32, #tpu.memory_space<vmem>>, vector<1x128xf32>
    %4 = vector.broadcast %3 : vector<1x128xf32> to vector<8x128xf32>
    %5 = arith.addf %2, %4 : vector<8x128xf32>
    %cst_5 = arith.constant 0.000000e+00 : f32
    %6 = vector.broadcast %cst_5 : f32 to vector<8x128xf32>
    %7 = arith.maximumf %5, %6 : vector<8x128xf32>
    %8 = arith.truncf %7 : vector<8x128xf32> to vector<8x128xbf16>
    %c0_6 = arith.constant 0 : index
    %c0_7 = arith.constant 0 : index
    %9 = vector.load %arg4[%c0_6, %c0_7] : memref<128x128xbf16, #tpu.memory_space<vmem>>, vector<128x128xbf16>
    %cst_8 = arith.constant dense<0.000000e+00> : vector<8x128xf32>
    %10 = tpu.matmul %8, %9, %cst_8 {dimension_numbers = #tpu.dot_dimension_numbers<[1], [0], [0], [1], [0, 0, 1, 1], [], []>} : vector<8x128xbf16>, vector<128x128xbf16>, vector<8x128xf32> -> vector<8x128xf32>
    %c0_9 = arith.constant 0 : index
    %c0_10 = arith.constant 0 : index
    %11 = vector.load %arg5[%c0_9, %c0_10] : memref<1x128xf32, #tpu.memory_space<vmem>>, vector<1x128xf32>
    %12 = vector.broadcast %11 : vector<1x128xf32> to vector<8x128xf32>
    %13 = arith.addf %10, %12 : vector<8x128xf32>
    %cst_11 = arith.constant 0.000000e+00 : f32
    %14 = vector.broadcast %cst_11 : f32 to vector<8x128xf32>
    %15 = arith.maximumf %13, %14 : vector<8x128xf32>
    %16 = arith.truncf %15 : vector<8x128xf32> to vector<8x128xbf16>
    %c0_12 = arith.constant 0 : index
    %c0_13 = arith.constant 0 : index
    %17 = vector.load %arg6[%c0_12, %c0_13] : memref<128x128xbf16, #tpu.memory_space<vmem>>, vector<128x128xbf16>
    %cst_14 = arith.constant dense<0.000000e+00> : vector<8x128xf32>
    %18 = tpu.matmul %16, %17, %cst_14 {dimension_numbers = #tpu.dot_dimension_numbers<[1], [0], [0], [1], [0, 0, 1, 1], [], []>} : vector<8x128xbf16>, vector<128x128xbf16>, vector<8x128xf32> -> vector<8x128xf32>
    %c0_15 = arith.constant 0 : index
    %c0_16 = arith.constant 0 : index
    %19 = vector.load %arg7[%c0_15, %c0_16] : memref<1x128xf32, #tpu.memory_space<vmem>>, vector<1x128xf32>
    %20 = vector.broadcast %19 : vector<1x128xf32> to vector<8x128xf32>
    %21 = arith.addf %18, %20 : vector<8x128xf32>
    %cst_17 = arith.constant 0.000000e+00 : f32
    %22 = vector.broadcast %cst_17 : f32 to vector<8x128xf32>
    %23 = arith.maximumf %21, %22 : vector<8x128xf32>
    %24 = arith.truncf %23 : vector<8x128xf32> to vector<8x128xbf16>
    %c0_18 = arith.constant 0 : index
    %c0_19 = arith.constant 0 : index
    %25 = vector.load %arg8[%c0_18, %c0_19] : memref<128x128xbf16, #tpu.memory_space<vmem>>, vector<128x128xbf16>
    %cst_20 = arith.constant dense<0.000000e+00> : vector<8x128xf32>
    %26 = tpu.matmul %24, %25, %cst_20 {dimension_numbers = #tpu.dot_dimension_numbers<[1], [0], [0], [1], [0, 0, 1, 1], [], []>} : vector<8x128xbf16>, vector<128x128xbf16>, vector<8x128xf32> -> vector<8x128xf32>
    %c0_21 = arith.constant 0 : index
    %c0_22 = arith.constant 0 : index
    %27 = vector.load %arg9[%c0_21, %c0_22] : memref<1x128xf32, #tpu.memory_space<vmem>>, vector<1x128xf32>
    %28 = vector.broadcast %27 : vector<1x128xf32> to vector<8x128xf32>
    %29 = arith.addf %26, %28 : vector<8x128xf32>
    %30 = arith.truncf %29 : vector<8x128xf32> to vector<8x128xbf16>
    %c0_23 = arith.constant 0 : index
    %c0_24 = arith.constant 0 : index
    %31 = vector.load %arg10[%c0_23, %c0_24] : memref<8x128xbf16, #tpu.memory_space<vmem>>, vector<8x128xbf16>
    tpu.vector_store %arg10[%c0_23, %c0_24], %30 {strides = array<i32>} : memref<8x128xbf16, #tpu.memory_space<vmem>>, vector<8x128xbf16>,
    return
  }
  func.func @transform_0(%arg0: i32) -> (i32, i32) {
    %c0_i32 = arith.constant 0 : i32
    %c0_i32_0 = arith.constant 0 : i32
    return %arg0, %c0_i32 : i32, i32
  }
  func.func @transform_1(%arg0: i32) -> (i32, i32) {
    %c0_i32 = arith.constant 0 : i32
    %c0_i32_0 = arith.constant 0 : i32
    %c0_i32_1 = arith.constant 0 : i32
    return %c0_i32, %c0_i32_0 : i32, i32
  }
  func.func @transform_2(%arg0: i32) -> (i32, i32) {
    %c0_i32 = arith.constant 0 : i32
    %c0_i32_0 = arith.constant 0 : i32
    %c0_i32_1 = arith.constant 0 : i32
    return %c0_i32, %c0_i32_0 : i32, i32
  }
  func.func @transform_3(%arg0: i32) -> (i32, i32) {
    %c0_i32 = arith.constant 0 : i32
    %c0_i32_0 = arith.constant 0 : i32
    %c0_i32_1 = arith.constant 0 : i32
    return %c0_i32, %c0_i32_0 : i32, i32
  }
  func.func @transform_4(%arg0: i32) -> (i32, i32) {
    %c0_i32 = arith.constant 0 : i32
    %c0_i32_0 = arith.constant 0 : i32
    %c0_i32_1 = arith.constant 0 : i32
    return %c0_i32, %c0_i32_0 : i32, i32
  }
  func.func @transform_5(%arg0: i32) -> (i32, i32) {
    %c0_i32 = arith.constant 0 : i32
    %c0_i32_0 = arith.constant 0 : i32
    %c0_i32_1 = arith.constant 0 : i32
    return %c0_i32, %c0_i32_0 : i32, i32
  }
  func.func @transform_6(%arg0: i32) -> (i32, i32) {
    %c0_i32 = arith.constant 0 : i32
    %c0_i32_0 = arith.constant 0 : i32
    %c0_i32_1 = arith.constant 0 : i32
    return %c0_i32, %c0_i32_0 : i32, i32
  }
  func.func @transform_7(%arg0: i32) -> (i32, i32) {
    %c0_i32 = arith.constant 0 : i32
    %c0_i32_0 = arith.constant 0 : i32
    %c0_i32_1 = arith.constant 0 : i32
    return %c0_i32, %c0_i32_0 : i32, i32
  }
  func.func @transform_8(%arg0: i32) -> (i32, i32) {
    %c0_i32 = arith.constant 0 : i32
    %c0_i32_0 = arith.constant 0 : i32
    %c0_i32_1 = arith.constant 0 : i32
    return %c0_i32, %c0_i32_0 : i32, i32
  }
  func.func @transform_9(%arg0: i32) -> (i32, i32) {
    %c0_i32 = arith.constant 0 : i32
    %c0_i32_0 = arith.constant 0 : i32
    return %arg0, %c0_i32 : i32, i32
  }
}

</mosaic_0001>

<bundles_post_ra>
// kernel: mlp_forward.1
= control target key start
LH: loop header
LB: loop body
LE: loop exit
PB: predicated region body
PF: predicated region fallthrough
CT: control target
= control target key end

     0   :  { %14 = vsyncpa [#allocation3], 0  ;;  %s704_s0 = inlined_call_operand.vmem [shape: bf16[8,16], index: 0, kind: input, shape index: {}]   ;;  %s705_s1 = inlined_call_operand.vmem [shape: bf16[16,128], index: 1, kind: input, shape index: {}]   ;;  %s706_s2 = inlined_call_operand.vmem [shape: f32[1,128], index: 2, kind: input, shape index: {}]   ;;  %s707_s3 = inlined_call_operand.hbm [shape: bf16[128,128], index: 3, kind: input, shape index: {}]   ;;  %s708_s4 = inlined_call_operand.vmem [shape: f32[1,128], index: 4, kind: input, shape index: {}]   ;;  %s709_s5 = inlined_call_operand.hbm [shape: bf16[128,128], index: 5, kind: input, shape index: {}]   ;;  %s710_s6 = inlined_call_operand.vmem [shape: f32[1,128], index: 6, kind: input, shape index: {}]   ;;  %s711_s7 = inlined_call_operand.hbm [shape: bf16[128,128], index: 7, kind: input, shape index: {}]   ;;  %s712_s8 = inlined_call_operand.vmem [shape: f32[1,128], index: 8, kind: input, shape index: {}]   ;;  %s713_s9 = inlined_call_operand.hbm [shape: bf16[8,128], index: 9, kind: output, shape index: {}]  }
   0x1   :  { %15 = vsyncpa [#allocation6], 0 }
   0x2   :  { %16 = vsyncpa [#allocation4], 0  ;;  %s42_s11 = sshll.u32 %s709_s5, 4  ;;  %s618_s12 = smov [#allocation5]   ;;  %s43_s11 = int_to_ptr.hbm [resolvable:$true] %s42_s11 }
   0x3   :  { %s44_s13 = sshll.u32 %s618_s12, 4  ;;  %s27_s16 = sshll.u32 %s707_s3, 4  ;;  %s45_s13 = int_to_ptr.vmem [resolvable:$true] %s44_s13  ;;  %s28_s16 = int_to_ptr.hbm [resolvable:$true] %s27_s16 }
   0x4   :  { %s619_s17 = smov 64   ;;  %s620_s18 = smov 4  }
   0x5   :  { %50 = dma.hbm_to_vmem [thread:$0]  %s43_s11, 1024, %s45_s13, [#allocation6], %s619_s17, %s619_s17, %s620_s18  }
   0x6   :  { %s621_s19 = smov [#allocation2]   ;;  %s57_s23 = sshll.u32 %s711_s7, 4  ;;  %s58_s23 = int_to_ptr.hbm [resolvable:$true] %s57_s23 }
   0x7   :  { %s29_s20 = sshll.u32 %s621_s19, 4  ;;  %s622_s5 = smov [#allocation7]   ;;  %s30_s20 = int_to_ptr.vmem [resolvable:$true] %s29_s20 }
   0x8   :  { %35 = dma.hbm_to_vmem [thread:$0]  %s28_s16, 1024, %s30_s20, [#allocation3], %s619_s17, %s619_s17, %s620_s18  }
   0x9   :  { %s59_s24 = sshll.u32 %s622_s5, 4  ;;  %s60_s24 = int_to_ptr.vmem [resolvable:$true] %s59_s24 }
   0xa   :  { %65 = dma.hbm_to_vmem [thread:$0]  %s58_s23, 1024, %s60_s24, [#allocation6], %s619_s17, %s619_s17, %s620_s18  }
   0xb   :  { %612 = dma.done.wait [#allocation3], 1024  }
   0xc   :  { %613 = vsyncadd [#allocation3], 4294966272 }
   0xd   :  { %614 = dma.done.wait [#allocation6], 2048  }
   0xe   :  { %615 = vsyncadd [#allocation6], 4294965248  ;;  %v481_v0 = vld [vmem:[%s705_s1] sm:$0xff]  ;;  %v489_v1 = vld [vmem:[#allocation2 + $0x38] sm:$0xff]  ;;  %vm94_vm0 = vcmask 130048   ;;  %s623_s10 = smov [#allocation8]  }
   0xf   :  { %105 = vmatpush.bf16.msra.mxu0 %v481_v0  ;;  %v81_v2 = vld [vmem:[%s704_s0] sm:$0xf]  ;;  %181 = vmatpush.bf16.msra.mxu1 %v489_v1  ;;  %v488_v3 = vld [vmem:[#allocation2 + $0x30] sm:$0xff]  ;;  %v487_v4 = vld [vmem:[#allocation2 + $0x28] sm:$0xff]  ;;  %s367_s11 = sshll.u32 %s623_s10, 4  ;;  %s369_s14 = sshll.u32 %s713_s9, 4  ;;  %s368_s11 = int_to_ptr.vmem [resolvable:$true] %s367_s11  ;;  %s370_s14 = int_to_ptr.hbm [resolvable:$true] %s369_s14 }
  0x10   :  { %v486_v5 = vld [vmem:[#allocation2 + $0x20] sm:$0xff]  ;;  %v485_v6 = vld [vmem:[#allocation2 + $0x18] sm:$0xff]  ;;  %v484_v7 = vld [vmem:[#allocation2 + $0x10] sm:$0xff] }
  0x11   :  { %v483_v8 = vld [vmem:[#allocation2 + $0x8] sm:$0xff]  ;;  %v482_v9 = vld [vmem:[#allocation2] sm:$0xff]  ;;  %v497_v10 = vld [vmem:[#allocation5 + $0x38] sm:$0xff] }
  0x12   :  { %384 = vmatmul.msk.bf16.vlgmr.msra.gmra.mxu0 %vm94_vm0, %v81_v2  ;;  %264 = vmatpush.bf16.msra.mxu2 %v497_v10  ;;  %v496_v11 = vld [vmem:[#allocation5 + $0x30] sm:$0xff]  ;;  %v495_v12 = vld [vmem:[#allocation5 + $0x28] sm:$0xff]  ;;  %v494_v13 = vld [vmem:[#allocation5 + $0x20] sm:$0xff] }
  0x13   :  { %182 = vmatpush.bf16.msra.mxu1 %v488_v3  ;;  %v493_v14 = vld [vmem:[#allocation5 + $0x18] sm:$0xff]  ;;  %v492_v15 = vld [vmem:[#allocation5 + $0x10] sm:$0xff]  ;;  %v512_v16 = vld [vmem:[%s706_s2] ss:$0 sm:$0xff] }
  0x14   :  { %v491_v22 = vld [vmem:[#allocation5 + $0x8] sm:$0xff]  ;;  %v490_v23 = vld [vmem:[#allocation5] sm:$0xff]  ;;  %v505_v24 = vld [vmem:[#allocation7 + $0x38] sm:$0xff] }
  0x15   :  { %347 = vmatpush.bf16.msra.mxu3 %v505_v24  ;;  %v504_v25 = vld [vmem:[#allocation7 + $0x30] sm:$0xff]  ;;  %v503_v26 = vld [vmem:[#allocation7 + $0x28] sm:$0xff]  ;;  %v502_v27 = vld [vmem:[#allocation7 + $0x20] sm:$0xff] }
  0x16   :  { %265 = vmatpush.bf16.msra.mxu2 %v496_v11  ;;  %v501_v28 = vld [vmem:[#allocation7 + $0x18] sm:$0xff]  ;;  %v500_v29 = vld [vmem:[#allocation7 + $0x10] sm:$0xff]  ;;  %v513_v30 = vld [vmem:[%s708_s4] ss:$0 sm:$0xff] }
  0x17   :  { %183 = vmatpush.bf16.msra.mxu1 %v487_v4  ;;  %v499_v36 = vld [vmem:[#allocation7 + $0x8] sm:$0xff]  ;;  %v498_v37 = vld [vmem:[#allocation7] sm:$0xff] }
  0x18   :  { %v514_v38 = vld [vmem:[%s710_s6] ss:$0 sm:$0xff] }
  0x19   :  { %348 = vmatpush.bf16.msra.mxu3 %v504_v25  ;;  %v515_v44 = vld [vmem:[%s712_s8] ss:$0 sm:$0xff] }
  0x1a   :  { %266 = vmatpush.bf16.msra.mxu2 %v495_v12 }
  0x1b   :  { %184 = vmatpush.bf16.msra.mxu1 %v486_v5 }
  0x1d   :  { %349 = vmatpush.bf16.msra.mxu3 %v503_v26 }
  0x1e   :  { %267 = vmatpush.bf16.msra.mxu2 %v494_v13 }
  0x1f   :  { %185 = vmatpush.bf16.msra.mxu1 %v485_v6 }
  0x21   :  { %350 = vmatpush.bf16.msra.mxu3 %v502_v27 }
  0x22   :  { %268 = vmatpush.bf16.msra.mxu2 %v493_v14 }
  0x23   :  { %186 = vmatpush.bf16.msra.mxu1 %v484_v7 }
  0x25   :  { %351 = vmatpush.bf16.msra.mxu3 %v501_v28 }
  0x26   :  { %269 = vmatpush.bf16.msra.mxu2 %v492_v15 }
  0x27   :  { %187 = vmatpush.bf16.msra.mxu1 %v483_v8 }
  0x29   :  { %352 = vmatpush.bf16.msra.mxu3 %v500_v29 }
  0x2a   :  { %270 = vmatpush.bf16.msra.mxu2 %v491_v22 }
  0x2b   :  { %188 = vmatpush.bf16.msra.mxu1 %v482_v9 }
  0x2d   :  { %353 = vmatpush.bf16.msra.mxu3 %v499_v36 }
  0x2e   :  { %271 = vmatpush.bf16.msra.mxu2 %v490_v23 }
  0x31   :  { %354 = vmatpush.bf16.msra.mxu3 %v498_v37 }
  0x8f   :  { %v107_v17 = vpop.f32.mrf.mxu0 }
  0x90   :  { %v108_v18 = vadd.f32 %v512_v16, %v107_v17 }
  0x92   :  { %v111_v19 = vmax.f32 %v108_v18, 0.0 }
  0x94   :  { %v112_v20 = vpack.c.bf16 %v111_v19, %v111_v19 }
  0x96   :  { %189 = vmatmul.bf16.vlgmr.msra.gmra.mxu1 %v112_v20 }
  0x97   :  { %v109_v21 = vpop.f32.mrf.mxu0 }
 0x113   :  { %v190_v31 = vpop.f32.mrf.mxu1 }
 0x114   :  { %v191_v32 = vadd.f32 %v513_v30, %v190_v31 }
 0x116   :  { %v194_v33 = vmax.f32 %v191_v32, 0.0 }
 0x118   :  { %v195_v34 = vpack.c.bf16 %v194_v33, %v194_v33 }
 0x11a   :  { %272 = vmatmul.bf16.vlgmr.msra.gmra.mxu2 %v195_v34 }
 0x11b   :  { %v192_v35 = vpop.f32.mrf.mxu1 }
 0x19d   :  { %v273_v39 = vpop.f32.mrf.mxu2 }
 0x19e   :  { %v274_v40 = vadd.f32 %v514_v38, %v273_v39 }
 0x1a0   :  { %v277_v41 = vmax.f32 %v274_v40, 0.0 }
 0x1a2   :  { %v278_v42 = vpack.c.bf16 %v277_v41, %v277_v41 }
 0x1a4   :  { %355 = vmatmul.bf16.vlgmr.msra.gmra.mxu3 %v278_v42 }
 0x1a5   :  { %v275_v43 = vpop.f32.mrf.mxu2 }
 0x227   :  { %v356_v45 = vpop.f32.mrf.mxu3 }
 0x228   :  { %v357_v46 = vadd.f32 %v515_v44, %v356_v45 }
 0x22a   :  { %v360_v47 = vpack.c.bf16 %v357_v46, %v357_v46 }
 0x22c   :  { %361 = vst [vmem:[#allocation8] sm:$0xf] %v360_v47 }
 0x22d   :  { %372 = dma.vmem_to_hbm [thread:$0]  %s368_s11, 64, %s370_s14, [#allocation4]  }
 0x22f   :  { %v358_v48 = vpop.f32.mrf.mxu3 }
 0x230   :  { %616 = dma.done.wait [#allocation4], 64  }
 0x231   :  { %617 = vsyncadd [#allocation4], 4294967232 }
 0x232   :  { %377 = vsyncpa [#allocation3], 1 }
 0x233   :  { %378 = vsyncpa [#allocation6], 1 }
 0x234   :  { %379 = vsyncpa [#allocation4], 1 }

</bundles_post_ra>
